<compile_context>
chip_gen: v5e
topology: v5e:2x2
jax: 0.10.0
libtpu: 0.0.40
codegen_flags: <defaults>
</compile_context>

<pallas_src>
import functools

import jax
import jax.numpy as jnp
from jax.experimental import pallas as pl
from jax.experimental.pallas import tpu as pltpu


def _mask_ln3d_kernel(x_ref, w_ref, b_ref, o_ref, *, eps, c):
    x = x_ref[...].astype(jnp.float32)                   # (row_tile, C)
    # One-pass stats: mean = s1/C, unbiased var = (s2 - mean*s1) / (C-1).
    s1 = jnp.sum(x, axis=-1, keepdims=True)
    s2 = jnp.sum(x * x, axis=-1, keepdims=True)
    mean = s1 * (1.0 / c)
    # NOTE: C == 1 is unsupported (torch.var with C-1 divisor is also 0/0).
    var = (s2 - mean * s1) * (1.0 / (c - 1)) + eps
    inv = jax.lax.rsqrt(var)                              # EUP, off the VALU path
    w = w_ref[...].astype(jnp.float32)                    # (1, C), broadcasts
    b = b_ref[...].astype(jnp.float32)                    # (1, C), broadcasts
    o_ref[...] = ((x - mean) * inv * w + b).astype(o_ref.dtype)


def mask_layernorm3d(x, weight, bias, *, eps=1e-5, row_tile=None):
    """x: (T, B, C); weight/bias: (C,). Returns (T, B, C)."""
    T, B, C = x.shape
    rows = T * B
    x2 = x.reshape(rows, C)
    w2 = weight.reshape(1, C)
    b2 = bias.reshape(1, C)

    itemsize = jnp.dtype(x.dtype).itemsize
    # Sublane packing of the second-to-last dim per dtype width.
    sub = {4: 8, 2: 16, 1: 32}.get(itemsize, 8)

    if row_tile is None:
        # Target ~2 MiB per input block (in + out double-buffered ~= 8 MiB,
        # well inside VMEM and on the flat part of the HBM roofline).
        target_rows = max(sub, (2 << 20) // max(1, C * itemsize))
        row_tile = max(sub, (target_rows // sub) * sub)
        if row_tile >= rows:
            # Single block covering the full row extent (always a legal block).
            row_tile = rows

    grid = pl.cdiv(rows, row_tile)
    block_bytes = row_tile * C * itemsize
    # in + out blocks, double-buffered (4x), plus weight/bias, f32 temps and
    # headroom; cap at 64 MiB so it is valid on v7x while raising the default
    # scoped limit on v5e/v6e for larger-C configurations.
    vmem_limit = int(min(64 * 1024 * 1024, max(32 * 1024 * 1024, 6 * block_bytes)))

    kernel = functools.partial(_mask_ln3d_kernel, eps=eps, c=C)
    out2 = pl.pallas_call(
        kernel,
        out_shape=jax.ShapeDtypeStruct((rows, C), x.dtype),
        grid_spec=pl.GridSpec(
            grid=(grid,),
            in_specs=[
                pl.BlockSpec((row_tile, C), lambda i: (i, 0)),
                pl.BlockSpec((1, C), lambda i: (0, 0)),
                pl.BlockSpec((1, C), lambda i: (0, 0)),
            ],
            out_specs=pl.BlockSpec((row_tile, C), lambda i: (i, 0)),
        ),
        compiler_params=pltpu.CompilerParams(
            dimension_semantics=("parallel",),
            vmem_limit_bytes=vmem_limit,
        ),
    )(x2, w2, b2)
    return out2.reshape(T, B, C)


if __name__ == "__main__":
    key = jax.random.PRNGKey(0)
    T, B, C = 8, 2, 32
    x = jax.random.normal(key, (T, B, C), dtype=jnp.float32)

    # Deterministic init matching reset_parameters(): weight=1, bias=0.
    weight = jnp.ones((C,), dtype=jnp.float32)
    bias = jnp.zeros((C,), dtype=jnp.float32)

    out = mask_layernorm3d(x, weight, bias, eps=1e-5)
    out = jax.block_until_ready(out)

    # Pure-JAX reference (unbiased variance, eps added to var — matches the
    # PyTorch module's forward).
    mean = jnp.mean(x, axis=2, keepdims=True)
    var = jnp.sum((x - mean) ** 2, axis=2, keepdims=True) / (C - 1) + 1e-5
    ref = (x - mean) / jnp.sqrt(var) * weight + bias
    assert jnp.allclose(out, ref, atol=1e-5, rtol=1e-5), "mismatch vs reference"

    # TODO(synk): pad_mask is accepted by the PyTorch forward but never used;
    # intentionally not implemented here.

    print("KERNEL_OK")
</pallas_src>

<mosaic_0001>
module attributes {stable_mosaic.version = 11 : i64} {
  func.func @_mask_ln3d_kernel(%arg0: i32, %arg1: memref<16x32xf32, #tpu.memory_space<vmem>>, %arg2: memref<1x32xf32, #tpu.memory_space<vmem>>, %arg3: memref<1x32xf32, #tpu.memory_space<vmem>>, %arg4: memref<16x32xf32, #tpu.memory_space<vmem>>) attributes {dimension_semantics = [#tpu.dimension_semantics<parallel>], iteration_bounds = array<i64: 1>, scalar_prefetch = 0 : i64, scratch_operands = 0 : i64, tpu.core_type = #tpu.core_type<tc>, window_params = [{transform_indices = @transform_0, window_bounds = array<i64: 16, 32>}, {pipeline_mode = #tpu.pipeline_mode<synchronous>, transform_indices = @transform_1, window_bounds = array<i64: 1, 32>}, {pipeline_mode = #tpu.pipeline_mode<synchronous>, transform_indices = @transform_2, window_bounds = array<i64: 1, 32>}, {transform_indices = @transform_3, window_bounds = array<i64: 16, 32>}]} {
    %c0 = arith.constant 0 : index
    %c0_0 = arith.constant 0 : index
    %0 = vector.load %arg1[%c0, %c0_0] : memref<16x32xf32, #tpu.memory_space<vmem>>, vector<16x32xf32>
    %cst = arith.constant dense<0.000000e+00> : vector<16xf32>
    %1 = vector.multi_reduction <add>, %0, %cst [1] : vector<16x32xf32> to vector<16xf32>
    %2 = vector.shape_cast %1 : vector<16xf32> to vector<16x1xf32>
    %3 = arith.mulf %0, %0 : vector<16x32xf32>
    %cst_1 = arith.constant dense<0.000000e+00> : vector<16xf32>
    %4 = vector.multi_reduction <add>, %3, %cst_1 [1] : vector<16x32xf32> to vector<16xf32>
    %5 = vector.shape_cast %4 : vector<16xf32> to vector<16x1xf32>
    %cst_2 = arith.constant 3.125000e-02 : f32
    %6 = vector.broadcast %cst_2 : f32 to vector<16x1xf32>
    %7 = arith.mulf %2, %6 : vector<16x1xf32>
    %8 = arith.mulf %7, %2 : vector<16x1xf32>
    %9 = arith.subf %5, %8 : vector<16x1xf32>
    %cst_3 = arith.constant 0.0322580636 : f32
    %10 = vector.broadcast %cst_3 : f32 to vector<16x1xf32>
    %11 = arith.mulf %9, %10 : vector<16x1xf32>
    %cst_4 = arith.constant 9.99999974E-6 : f32
    %12 = vector.broadcast %cst_4 : f32 to vector<16x1xf32>
    %13 = arith.addf %11, %12 : vector<16x1xf32>
    %14 = math.rsqrt %13 : vector<16x1xf32>
    %c0_5 = arith.constant 0 : index
    %c0_6 = arith.constant 0 : index
    %15 = vector.load %arg2[%c0_5, %c0_6] : memref<1x32xf32, #tpu.memory_space<vmem>>, vector<1x32xf32>
    %c0_7 = arith.constant 0 : index
    %c0_8 = arith.constant 0 : index
    %16 = vector.load %arg3[%c0_7, %c0_8] : memref<1x32xf32, #tpu.memory_space<vmem>>, vector<1x32xf32>
    %17 = vector.broadcast %7 : vector<16x1xf32> to vector<16x32xf32>
    %18 = arith.subf %0, %17 : vector<16x32xf32>
    %19 = vector.broadcast %14 : vector<16x1xf32> to vector<16x32xf32>
    %20 = arith.mulf %18, %19 : vector<16x32xf32>
    %21 = vector.broadcast %15 : vector<1x32xf32> to vector<16x32xf32>
    %22 = arith.mulf %20, %21 : vector<16x32xf32>
    %23 = vector.broadcast %16 : vector<1x32xf32> to vector<16x32xf32>
    %24 = arith.addf %22, %23 : vector<16x32xf32>
    %c0_9 = arith.constant 0 : index
    %c0_10 = arith.constant 0 : index
    %25 = vector.load %arg4[%c0_9, %c0_10] : memref<16x32xf32, #tpu.memory_space<vmem>>, vector<16x32xf32>
    tpu.vector_store %arg4[%c0_9, %c0_10], %24 {strides = array<i32>} : memref<16x32xf32, #tpu.memory_space<vmem>>, vector<16x32xf32>,
    return
  }
  func.func @transform_0(%arg0: i32) -> (i32, i32) {
    %c0_i32 = arith.constant 0 : i32
    %c0_i32_0 = arith.constant 0 : i32
    return %arg0, %c0_i32 : i32, i32
  }
  func.func @transform_1(%arg0: i32) -> (i32, i32) {
    %c0_i32 = arith.constant 0 : i32
    %c0_i32_0 = arith.constant 0 : i32
    %c0_i32_1 = arith.constant 0 : i32
    return %c0_i32, %c0_i32_0 : i32, i32
  }
  func.func @transform_2(%arg0: i32) -> (i32, i32) {
    %c0_i32 = arith.constant 0 : i32
    %c0_i32_0 = arith.constant 0 : i32
    %c0_i32_1 = arith.constant 0 : i32
    return %c0_i32, %c0_i32_0 : i32, i32
  }
  func.func @transform_3(%arg0: i32) -> (i32, i32) {
    %c0_i32 = arith.constant 0 : i32
    %c0_i32_0 = arith.constant 0 : i32
    return %arg0, %c0_i32 : i32, i32
  }
}

</mosaic_0001>

<bundles_post_ra>
// kernel: tpu_custom_call.1
= control target key start
LH: loop header
LB: loop body
LE: loop exit
PB: predicated region body
PF: predicated region fallthrough
CT: control target
= control target key end

     0   :  { %8 = vsyncpa [#allocation3], 0  ;;  %s268_s0 = inlined_call_operand.hbm [shape: f32[16,32], index: 0, kind: input, shape index: {}]   ;;  %s269_s1 = inlined_call_operand.hbm [shape: f32[1,32], index: 1, kind: input, shape index: {}]   ;;  %s270_s2 = inlined_call_operand.vmem [shape: f32[1,32], index: 2, kind: input, shape index: {}]   ;;  %s271_s3 = inlined_call_operand.hbm [shape: f32[16,32], index: 3, kind: output, shape index: {}]  }
   0x1   :  { %9 = vsyncpa [#allocation6], 0 }
   0x2   :  { %10 = vsyncpa [#allocation4], 0  ;;  %s15_s14 = sshll.u32 %s268_s0, 4  ;;  %s219_s15 = smov [#allocation2]   ;;  %s16_s14 = int_to_ptr.hbm [resolvable:$true] %s15_s14 }
   0x3   :  { %s17_s16 = sshll.u32 %s219_s15, 4  ;;  %s29_s19 = sshll.u32 %s269_s1, 4  ;;  %s18_s16 = int_to_ptr.vmem [resolvable:$true] %s17_s16  ;;  %s30_s19 = int_to_ptr.hbm [resolvable:$true] %s29_s19 }
   0x4   :  { %s220_s20 = smov 128   ;;  %s221_s21 = smov 8  }
   0x5   :  { %23 = dma.hbm_to_vmem [thread:$0]  %s16_s14, 256, %s18_s16, [#allocation3], %s220_s20, %s220_s20, %s221_s21  }
   0x6   :  { %s222_s22 = smov [#allocation5]  }
   0x7   :  { %s31_s23 = sshll.u32 %s222_s22, 4  ;;  %s32_s23 = int_to_ptr.vmem [resolvable:$true] %s31_s23 }
   0x8   :  { %34 = dma.hbm_to_vmem [thread:$0]  %s30_s19, 16, %s32_s23, [#allocation6]  }
   0x9   :  { %213 = dma.done.wait [#allocation3], 256  }
   0xa   :  { %214 = vsyncadd [#allocation3], 4294967040 }
   0xb   :  { %215 = dma.done.wait [#allocation6], 16  }
   0xc   :  { %216 = vsyncadd [#allocation6], 4294967280  ;;  %vm47_vm0 = vcmask 261120   ;;  %v45_v0 = vld [vmem:[#allocation2] sm:$0xff]  ;;  %v46_v4 = vld [vmem:[#allocation2 + $0x8] sm:$0xff]  ;;  %s223_s24 = smov [#allocation7]  }
   0xd   :  { %v48_v1 = vsel %vm47_vm0, %v45_v0, 0.0  ;;  %v54_v2 = vmul.f32 %v45_v0, %v45_v0  ;;  %v55_v5 = vmul.f32 %v46_v4, %v46_v4  ;;  %v51_v6 = vsel %vm47_vm0, %v46_v4, 0.0  ;;  %v135_v31 = vld [vmem:[#allocation5] ss:$0 sm:$0xff]  ;;  %v136_v35 = vld [vmem:[%s270_s2] ss:$0 sm:$0xff] }
   0xe   :  { %49 = vadd.xlane.f32.xlu0 %v48_v1  ;;  %s114_s25 = sshll.u32 %s223_s24, 4  ;;  %s116_s28 = sshll.u32 %s271_s3, 4  ;;  %s115_s25 = int_to_ptr.vmem [resolvable:$true] %s114_s25  ;;  %s117_s28 = int_to_ptr.hbm [resolvable:$true] %s116_s28 }
   0xf   :  { %v56_v3 = vsel %vm47_vm0, %v54_v2, 0.0  ;;  %v59_v7 = vsel %vm47_vm0, %v55_v5, 0.0 }
  0x10   :  { %57 = vadd.xlane.f32.xlu1 %v56_v3 }
  0x16   :  { %52 = vadd.xlane.f32.xlu0 %v51_v6 }
  0x18   :  { %60 = vadd.xlane.f32.xlu1 %v59_v7 }
  0x81   :  { %v50_v8 = vpop.xlane.xlu0 %49 }
  0x82   :  { %v62_v9 = vmul.f32 0.03125, %v50_v8 }
  0x83   :  { %v58_v10 = vpop.xlane.xlu1 %57 }
  0x84   :  { %v64_v11 = vmul.f32 %v62_v9, %v50_v8  ;;  %v94_v30 = vsub.f32 %v45_v0, %v62_v9 }
  0x86   :  { %v66_v12 = vsub.f32 %v58_v10, %v64_v11 }
  0x88   :  { %v68_v13 = vmul.f32 0.032258064, %v66_v12 }
  0x89   :  { %v53_v14 = vpop.xlane.xlu0 %52 }
  0x8a   :  { %v70_v15 = vadd.f32 1e-05, %v68_v13  ;;  %v63_v16 = vmul.f32 0.03125, %v53_v14 }
  0x8b   :  { %v61_v17 = vpop.xlane.xlu1 %60 }
  0x8c   :  { %137 = vrsqrt.f32 %v70_v15  ;;  %v65_v18 = vmul.f32 %v63_v16, %v53_v14  ;;  %vm78_vm2 = vweird.f32 %v70_v15  ;;  %v95_v41 = vsub.f32 %v46_v4, %v63_v16 }
  0x8e   :  { %v67_v19 = vsub.f32 %v61_v17, %v65_v18 }
  0x90   :  { %v69_v20 = vmul.f32 0.032258064, %v67_v19 }
  0x92   :  { %v138_v21 = vpop.eup %137  ;;  %v71_v22 = vadd.f32 1e-05, %v69_v20 }
  0x93   :  { %v73_v23 = vmul.f32 %v138_v21, %v70_v15  ;;  %vm79_vm1 = vweird.f32 %v138_v21 }
  0x94   :  { %139 = vrsqrt.f32 %v71_v22  ;;  %vm80_vm3 = vmor %vm78_vm2, %vm79_vm1  ;;  %vm88_vm5 = vweird.f32 %v71_v22 }
  0x95   :  { %v74_v24 = vmul.f32 %v138_v21, %v73_v23 }
  0x97   :  { %v75_v25 = vmul.f32 0.5, %v74_v24 }
  0x99   :  { %v76_v26 = vsub.f32 1.5, %v75_v25 }
  0x9a   :  { %v140_v27 = vpop.eup %139 }
  0x9b   :  { %v77_v28 = vmul.f32 %v138_v21, %v76_v26  ;;  %v83_v29 = vmul.f32 %v140_v27, %v71_v22  ;;  %vm89_vm4 = vweird.f32 %v140_v27 }
  0x9c   :  { %vm90_vm6 = vmor %vm88_vm5, %vm89_vm4 }
  0x9d   :  { %v81_v32 = vsel %vm80_vm3, %v138_v21, %v77_v28  ;;  %v84_v33 = vmul.f32 %v140_v27, %v83_v29 }
  0x9e   :  { %v96_v34 = vmul.f32 %v94_v30, %v81_v32 }
  0x9f   :  { %v85_v36 = vmul.f32 0.5, %v84_v33 }
  0xa0   :  { %v101_v37 = vmul.f32 %v135_v31, %v96_v34 }
  0xa1   :  { %v86_v38 = vsub.f32 1.5, %v85_v36 }
  0xa2   :  { %v106_v39 = vadd.f32 %v136_v35, %v101_v37 }
  0xa3   :  { %v87_v40 = vmul.f32 %v140_v27, %v86_v38 }
  0xa4   :  { %108 = vst.msk [vmem:[#allocation7] sm:$0xff] %vm47_vm0, %v106_v39 }
  0xa5   :  { %v91_v42 = vsel %vm90_vm6, %v140_v27, %v87_v40 }
  0xa6   :  { %v97_v43 = vmul.f32 %v95_v41, %v91_v42 }
  0xa8   :  { %v102_v44 = vmul.f32 %v135_v31, %v97_v43 }
  0xaa   :  { %v107_v45 = vadd.f32 %v136_v35, %v102_v44 }
  0xac   :  { %109 = vst.msk [vmem:[#allocation7 + $0x8] sm:$0xff] %vm47_vm0, %v107_v45 }
  0xad   :  { %122 = dma.vmem_to_hbm [thread:$0]  %s115_s25, 256, %s117_s28, [#allocation4], %s220_s20, %s220_s20, %s221_s21  }
  0xae   :  { %217 = dma.done.wait [#allocation4], 256  }
  0xaf   :  { %218 = vsyncadd [#allocation4], 4294967040 }
  0xb0   :  { %127 = vsyncpa [#allocation3], 1 }
  0xb1   :  { %128 = vsyncpa [#allocation6], 1 }
  0xb2   :  { %129 = vsyncpa [#allocation4], 1 }

</bundles_post_ra>
